<compile_context>
chip_gen: v5e
topology: v5e:2x2
jax: 0.10.0
libtpu: 0.0.40
codegen_flags: <defaults>
</compile_context>

<pallas_src>
import functools

import jax
import jax.numpy as jnp
from jax import lax
from jax.experimental import pallas as pl
from jax.experimental.pallas import tpu as pltpu


def bottleneck_kernel(x_ref, w1_ref, b1_ref, w2_ref, b2_ref, w3_ref, b3_ref,
                      o_ref, pad_ref, im_ref, *, H, W, Cin, P):
    HW = H * W

    x = x_ref[0]                                          # (Cin, HW) f32 (residual)

    # ---- conv1 (1x1) + folded-bn1 + relu ------------------------------------
    h1 = jnp.dot(w1_ref[...], x.astype(jnp.bfloat16),
                 preferred_element_type=jnp.float32)      # (P, HW)
    h1 = jnp.maximum(h1 + b1_ref[...], 0.0)

    # ---- conv2 (3x3, stride=1, pad=1) as a single im2col matmul -------------
    # Flat padded scratch along lanes: [ 0_{W+1} | h1_flat (HW) | 0_{W+1} ].
    # Only the (W+1)-wide borders need zeros; rewritten every step so the
    # kernel stays correct when the grid is split across TensorCores.
    pad_ref[:, 0:W + 1] = jnp.zeros((P, W + 1), jnp.float32)
    pad_ref[:, W + 1 + HW:] = jnp.zeros((P, W + 1), jnp.float32)
    pad_ref[:, W + 1:W + 1 + HW] = h1

    # Column-validity masks (handle the row-wrap of the flat layout).
    col = lax.broadcasted_iota(jnp.int32, (1, HW), 1) % W
    not_first = col != 0          # tap needs input column w-1
    not_last = col != (W - 1)     # tap needs input column w+1

    # Build im2col (9P, HW): tap-major, input-channel-minor along sublanes.
    for dy in range(3):
        for dx in range(3):
            t = dy * 3 + dx
            base = dy * W + dx
            win = pad_ref[:, base:base + HW]              # (P, HW)
            if dx == 0:
                win = jnp.where(not_first, win, 0.0)
            elif dx == 2:
                win = jnp.where(not_last, win, 0.0)
            im_ref[t * P:(t + 1) * P, :] = win

    h2 = jnp.dot(w2_ref[...], im_ref[...].astype(jnp.bfloat16),
                 preferred_element_type=jnp.float32)      # (P, HW)
    h2 = jnp.maximum(h2 + b2_ref[...], 0.0)

    # ---- conv3 (1x1) + folded-bn3 + residual + relu --------------------------
    h3 = jnp.dot(w3_ref[...], h2.astype(jnp.bfloat16),
                 preferred_element_type=jnp.float32)      # (Cout, HW)
    o_ref[0] = jnp.maximum(h3 + b3_ref[...] + x, 0.0)


def bottleneck_pallas(x_nchw, prep):
    N, Cin, H, W = x_nchw.shape
    P = prep["w1t"].shape[0]
    Cout = prep["w3t"].shape[0]
    HW = H * W
    assert Cin == Cout, "residual add requires inplanes == 4 * planes"

    x2 = x_nchw.reshape(N, Cin, HW)
    kernel = functools.partial(bottleneck_kernel, H=H, W=W, Cin=Cin, P=P)

    def rep(shape):
        return pl.BlockSpec(shape, lambda n: (0,) * len(shape))

    out = pl.pallas_call(
        kernel,
        out_shape=jax.ShapeDtypeStruct((N, Cout, HW), jnp.float32),
        grid_spec=pltpu.PrefetchScalarGridSpec(
            num_scalar_prefetch=0,
            grid=(N,),
            in_specs=[
                pl.BlockSpec((1, Cin, HW), lambda n: (n, 0, 0)),   # x (residual + conv1 in)
                rep((P, Cin)),        # w1t (bf16, BN folded)
                rep((P, 1)),          # b1
                rep((P, 9 * P)),      # w2t (bf16, BN folded, tap-major)
                rep((P, 1)),          # b2
                rep((Cout, P)),       # w3t (bf16, BN folded)
                rep((Cout, 1)),       # b3
            ],
            out_specs=pl.BlockSpec((1, Cout, HW), lambda n: (n, 0, 0)),
            scratch_shapes=[
                pltpu.VMEM((P, HW + 2 * W + 2), jnp.float32),   # flat padded h1
                pltpu.VMEM((9 * P, HW), jnp.float32),           # im2col
            ],
        ),
        compiler_params=pltpu.CompilerParams(
            dimension_semantics=("parallel",)),
    )(x2, prep["w1t"], prep["b1"], prep["w2t"], prep["b2"],
      prep["w3t"], prep["b3"])
    return out.reshape(N, Cout, H, W)


# ----------------------------------------------------------------------------
# Parameter construction: raw conv weights + BN stats, then BN folded into
# bf16 weights / f32 biases (exact for inference-mode BatchNorm).
# ----------------------------------------------------------------------------
def make_params(key, inplanes, planes, eps=1e-5):
    ks = jax.random.split(key, 12)
    Cout = 4 * planes

    def bn_fold(kg, kb, km, kv, c):
        gamma = 1.0 + 0.1 * jax.random.normal(kg, (c,), jnp.float32)
        beta = 0.1 * jax.random.normal(kb, (c,), jnp.float32)
        mean = 0.1 * jax.random.normal(km, (c,), jnp.float32)
        var = jnp.abs(jax.random.normal(kv, (c,), jnp.float32)) + 0.5
        scale = gamma / jnp.sqrt(var + eps)
        bias = beta - mean * scale
        return scale, bias

    w1 = 0.1 * jax.random.normal(ks[0], (inplanes, planes), jnp.float32)   # (Cin, P)
    w2 = 0.1 * jax.random.normal(ks[1], (9, planes, planes), jnp.float32)  # (tap, ci, co)
    w3 = 0.1 * jax.random.normal(ks[2], (planes, Cout), jnp.float32)       # (P, Cout)
    s1, b1 = bn_fold(ks[3], ks[4], ks[5], ks[6], planes)
    s2, b2 = bn_fold(ks[7], ks[8], ks[9], ks[10], planes)
    s3, b3 = bn_fold(ks[11], ks[3], ks[7], ks[0], Cout)
    return dict(w1=w1, w2=w2, w3=w3, s1=s1, b1=b1, s2=s2, b2=b2, s3=s3, b3=b3)


def prepare_params(params):
    P = params["w1"].shape[1]
    Cout = params["w3"].shape[1]
    s1, s2, s3 = params["s1"], params["s2"], params["s3"]
    # Fold BN scale into the (transposed) conv weights, cast to bf16 for MXU.
    w1t = (params["w1"].T * s1[:, None]).astype(jnp.bfloat16)                  # (P, Cin)
    w2t = (jnp.transpose(params["w2"], (2, 0, 1)).reshape(P, 9 * P)
           * s2[:, None]).astype(jnp.bfloat16)                                 # (P, 9P)
    w3t = (params["w3"].T * s3[:, None]).astype(jnp.bfloat16)                  # (Cout, P)
    return dict(
        w1t=w1t, b1=params["b1"].reshape(P, 1).astype(jnp.float32),
        w2t=w2t, b2=params["b2"].reshape(P, 1).astype(jnp.float32),
        w3t=w3t, b3=params["b3"].reshape(Cout, 1).astype(jnp.float32),
    )


# ----------------------------------------------------------------------------
# Pure-JAX reference (NCHW) using the SAME folded bf16 weights (f32 accumulate).
# ----------------------------------------------------------------------------
def bottleneck_ref(x_nchw, prep):
    _, Cin, _, _ = x_nchw.shape
    P = prep["w1t"].shape[0]
    Cout = prep["w3t"].shape[0]
    dn = ("NCHW", "OIHW", "NCHW")

    w1 = prep["w1t"].reshape(P, Cin, 1, 1)                         # OIHW
    # (co, t*P+ci) -> (co, ky, kx, ci) -> (co, ci, ky, kx)
    w2 = prep["w2t"].reshape(P, 3, 3, P).transpose(0, 3, 1, 2)
    w3 = prep["w3t"].reshape(Cout, P, 1, 1)

    def conv(x, w):
        return lax.conv_general_dilated(
            x.astype(jnp.bfloat16), w, (1, 1), "SAME",
            dimension_numbers=dn, preferred_element_type=jnp.float32)

    h = jnp.maximum(conv(x_nchw, w1) + prep["b1"].reshape(1, P, 1, 1), 0.0)
    h = jnp.maximum(conv(h, w2) + prep["b2"].reshape(1, P, 1, 1), 0.0)
    h = conv(h, w3) + prep["b3"].reshape(1, Cout, 1, 1)
    return jnp.maximum(h + x_nchw, 0.0)


if __name__ == "__main__":
    key = jax.random.PRNGKey(0)
    kx, kp = jax.random.split(key)

    N, inplanes, H, W = 2, 16, 16, 16       # x (NCHW): (2, 16, 16, 16)
    planes = 4                              # expansion 4 -> out channels 16

    x_nchw = jax.random.normal(kx, (N, inplanes, H, W), jnp.float32)
    params = make_params(kp, inplanes, planes)
    prep = prepare_params(params)

    out = bottleneck_pallas(x_nchw, prep)
    out = jax.block_until_ready(out)

    ref = bottleneck_ref(x_nchw, prep)
    assert out.shape == (N, 4 * planes, H, W)
    max_err = float(jnp.max(jnp.abs(out - ref)))
    assert jnp.allclose(out, ref, atol=1e-2, rtol=1e-2), max_err

    print("KERNEL_OK")
</pallas_src>

<mosaic_0001>
module attributes {stable_mosaic.version = 11 : i64} {
  func.func @bottleneck_kernel(%arg0: i32, %arg1: memref<1x16x256xf32, #tpu.memory_space<vmem>>, %arg2: memref<4x16xbf16, #tpu.memory_space<vmem>>, %arg3: memref<4x1xf32, #tpu.memory_space<vmem>>, %arg4: memref<4x36xbf16, #tpu.memory_space<vmem>>, %arg5: memref<4x1xf32, #tpu.memory_space<vmem>>, %arg6: memref<16x4xbf16, #tpu.memory_space<vmem>>, %arg7: memref<16x1xf32, #tpu.memory_space<vmem>>, %arg8: memref<1x16x256xf32, #tpu.memory_space<vmem>>, %arg9: memref<4x290xf32, #tpu.memory_space<vmem>>, %arg10: memref<36x256xf32, #tpu.memory_space<vmem>>) attributes {dimension_semantics = [#tpu.dimension_semantics<parallel>], iteration_bounds = array<i64: 2>, scalar_prefetch = 0 : i64, scratch_operands = 2 : i64, tpu.core_type = #tpu.core_type<tc>, window_params = [{transform_indices = @transform_0, window_bounds = array<i64: 1, 16, 256>}, {pipeline_mode = #tpu.pipeline_mode<synchronous>, transform_indices = @transform_1, window_bounds = array<i64: 4, 16>}, {pipeline_mode = #tpu.pipeline_mode<synchronous>, transform_indices = @transform_2, window_bounds = array<i64: 4, 1>}, {pipeline_mode = #tpu.pipeline_mode<synchronous>, transform_indices = @transform_3, window_bounds = array<i64: 4, 36>}, {pipeline_mode = #tpu.pipeline_mode<synchronous>, transform_indices = @transform_4, window_bounds = array<i64: 4, 1>}, {pipeline_mode = #tpu.pipeline_mode<synchronous>, transform_indices = @transform_5, window_bounds = array<i64: 16, 4>}, {pipeline_mode = #tpu.pipeline_mode<synchronous>, transform_indices = @transform_6, window_bounds = array<i64: 16, 1>}, {transform_indices = @transform_7, window_bounds = array<i64: 1, 16, 256>}]} {
    %c0 = arith.constant 0 : index
    %c0_0 = arith.constant 0 : index
    %c0_1 = arith.constant 0 : index
    %0 = vector.load %arg1[%c0, %c0_0, %c0_1] : memref<1x16x256xf32, #tpu.memory_space<vmem>>, vector<1x16x256xf32>
    %1 = vector.shape_cast %0 : vector<1x16x256xf32> to vector<16x256xf32>
    %c0_2 = arith.constant 0 : index
    %c0_3 = arith.constant 0 : index
    %2 = vector.load %arg2[%c0_2, %c0_3] : memref<4x16xbf16, #tpu.memory_space<vmem>>, vector<4x16xbf16>
    %3 = arith.truncf %1 : vector<16x256xf32> to vector<16x256xbf16>
    %cst = arith.constant dense<0.000000e+00> : vector<4x256xf32>
    %4 = tpu.matmul %2, %3, %cst {dimension_numbers = #tpu.dot_dimension_numbers<[1], [0], [0], [1], [0, 0, 1, 1], [], []>} : vector<4x16xbf16>, vector<16x256xbf16>, vector<4x256xf32> -> vector<4x256xf32>
    %c0_4 = arith.constant 0 : index
    %c0_5 = arith.constant 0 : index
    %5 = vector.load %arg3[%c0_4, %c0_5] : memref<4x1xf32, #tpu.memory_space<vmem>>, vector<4x1xf32>
    %6 = vector.broadcast %5 : vector<4x1xf32> to vector<4x256xf32>
    %7 = arith.addf %4, %6 : vector<4x256xf32>
    %cst_6 = arith.constant 0.000000e+00 : f32
    %8 = vector.broadcast %cst_6 : f32 to vector<4x256xf32>
    %9 = arith.maximumf %7, %8 : vector<4x256xf32>
    %cst_7 = arith.constant 0.000000e+00 : f32
    %10 = vector.broadcast %cst_7 : f32 to vector<4x17xf32>
    %c0_8 = arith.constant 0 : index
    %c0_9 = arith.constant 0 : index
    %11 = vector.load %arg9[%c0_8, %c0_9] : memref<4x290xf32, #tpu.memory_space<vmem>>, vector<4x17xf32>
    tpu.vector_store %arg9[%c0_8, %c0_9], %10 {strides = array<i32>} : memref<4x290xf32, #tpu.memory_space<vmem>>, vector<4x17xf32>,
    %cst_10 = arith.constant 0.000000e+00 : f32
    %12 = vector.broadcast %cst_10 : f32 to vector<4x17xf32>
    %c0_11 = arith.constant 0 : index
    %c273 = arith.constant 273 : index
    %13 = vector.load %arg9[%c0_11, %c273] : memref<4x290xf32, #tpu.memory_space<vmem>>, vector<4x17xf32>
    tpu.vector_store %arg9[%c0_11, %c273], %12 {strides = array<i32>} : memref<4x290xf32, #tpu.memory_space<vmem>>, vector<4x17xf32>,
    %c0_12 = arith.constant 0 : index
    %c17 = arith.constant 17 : index
    %14 = vector.load %arg9[%c0_12, %c17] : memref<4x290xf32, #tpu.memory_space<vmem>>, vector<4x256xf32>
    tpu.vector_store %arg9[%c0_12, %c17], %9 {strides = array<i32>} : memref<4x290xf32, #tpu.memory_space<vmem>>, vector<4x256xf32>,
    %15 = tpu.iota {dimensions = array<i32: 1>} : vector<1x256xi32>
    %c16_i32 = arith.constant 16 : i32
    %c0_i32 = arith.constant 0 : i32
    %16 = arith.cmpi eq, %c16_i32, %c0_i32 : i32
    %c1_i32 = arith.constant 1 : i32
    %17 = arith.select %16, %c1_i32, %c16_i32 : i32
    %18 = vector.broadcast %17 : i32 to vector<1x256xi32>
    %19 = arith.remsi %15, %18 : vector<1x256xi32>
    %c0_i32_13 = arith.constant 0 : i32
    %20 = vector.broadcast %c0_i32_13 : i32 to vector<1x256xi32>
    %21 = arith.cmpi ne, %19, %20 : vector<1x256xi32>
    %c0_i32_14 = arith.constant 0 : i32
    %22 = vector.broadcast %c0_i32_14 : i32 to vector<1x256xi32>
    %23 = arith.cmpi slt, %19, %22 : vector<1x256xi32>
    %c0_i32_15 = arith.constant 0 : i32
    %24 = arith.cmpi slt, %17, %c0_i32_15 : i32
    %25 = vector.broadcast %24 : i1 to vector<1x256xi1>
    %26 = vector.broadcast %25 : vector<1x256xi1> to vector<1x256xi1>
    %27 = arith.xori %23, %26 : vector<1x256xi1>
    %28 = arith.andi %27, %21 : vector<1x256xi1>
    %29 = vector.broadcast %17 : i32 to vector<1x256xi32>
    %30 = arith.addi %19, %29 : vector<1x256xi32>
    %31 = arith.select %28, %30, %19 : vector<1x256xi1>, vector<1x256xi32>
    %c0_i32_16 = arith.constant 0 : i32
    %32 = vector.broadcast %c0_i32_16 : i32 to vector<1x256xi32>
    %33 = arith.cmpi ne, %31, %32 : vector<1x256xi32>
    %c15_i32 = arith.constant 15 : i32
    %34 = vector.broadcast %c15_i32 : i32 to vector<1x256xi32>
    %35 = arith.cmpi ne, %31, %34 : vector<1x256xi32>
    %c0_17 = arith.constant 0 : index
    %c0_18 = arith.constant 0 : index
    %36 = vector.load %arg9[%c0_17, %c0_18] : memref<4x290xf32, #tpu.memory_space<vmem>>, vector<4x256xf32>
    %cst_19 = arith.constant 0.000000e+00 : f32
    %37 = vector.shape_cast %33 : vector<1x256xi1> to vector<1x256xi1>
    %38 = vector.broadcast %37 : vector<1x256xi1> to vector<4x256xi1>
    %39 = vector.broadcast %cst_19 : f32 to vector<4x256xf32>
    %40 = arith.select %38, %36, %39 : vector<4x256xi1>, vector<4x256xf32>
    %c0_20 = arith.constant 0 : index
    %c0_21 = arith.constant 0 : index
    %41 = vector.load %arg10[%c0_20, %c0_21] : memref<36x256xf32, #tpu.memory_space<vmem>>, vector<4x256xf32>
    tpu.vector_store %arg10[%c0_20, %c0_21], %40 {strides = array<i32>} : memref<36x256xf32, #tpu.memory_space<vmem>>, vector<4x256xf32>,
    %c0_22 = arith.constant 0 : index
    %c1 = arith.constant 1 : index
    %42 = vector.load %arg9[%c0_22, %c1] : memref<4x290xf32, #tpu.memory_space<vmem>>, vector<4x256xf32>
    %c4 = arith.constant 4 : index
    %c0_23 = arith.constant 0 : index
    %43 = vector.load %arg10[%c4, %c0_23] : memref<36x256xf32, #tpu.memory_space<vmem>>, vector<4x256xf32>
    tpu.vector_store %arg10[%c4, %c0_23], %42 {strides = array<i32>} : memref<36x256xf32, #tpu.memory_space<vmem>>, vector<4x256xf32>,
    %c0_24 = arith.constant 0 : index
    %c2 = arith.constant 2 : index
    %44 = vector.load %arg9[%c0_24, %c2] : memref<4x290xf32, #tpu.memory_space<vmem>>, vector<4x256xf32>
    %cst_25 = arith.constant 0.000000e+00 : f32
    %45 = vector.shape_cast %35 : vector<1x256xi1> to vector<1x256xi1>
    %46 = vector.broadcast %45 : vector<1x256xi1> to vector<4x256xi1>
    %47 = vector.broadcast %cst_25 : f32 to vector<4x256xf32>
    %48 = arith.select %46, %44, %47 : vector<4x256xi1>, vector<4x256xf32>
    %c8 = arith.constant 8 : index
    %c0_26 = arith.constant 0 : index
    %49 = vector.load %arg10[%c8, %c0_26] : memref<36x256xf32, #tpu.memory_space<vmem>>, vector<4x256xf32>
    tpu.vector_store %arg10[%c8, %c0_26], %48 {strides = array<i32>} : memref<36x256xf32, #tpu.memory_space<vmem>>, vector<4x256xf32>,
    %c0_27 = arith.constant 0 : index
    %c16 = arith.constant 16 : index
    %50 = vector.load %arg9[%c0_27, %c16] : memref<4x290xf32, #tpu.memory_space<vmem>>, vector<4x256xf32>
    %cst_28 = arith.constant 0.000000e+00 : f32
    %51 = vector.shape_cast %33 : vector<1x256xi1> to vector<1x256xi1>
    %52 = vector.broadcast %51 : vector<1x256xi1> to vector<4x256xi1>
    %53 = vector.broadcast %cst_28 : f32 to vector<4x256xf32>
    %54 = arith.select %52, %50, %53 : vector<4x256xi1>, vector<4x256xf32>
    %c12 = arith.constant 12 : index
    %c0_29 = arith.constant 0 : index
    %55 = vector.load %arg10[%c12, %c0_29] : memref<36x256xf32, #tpu.memory_space<vmem>>, vector<4x256xf32>
    tpu.vector_store %arg10[%c12, %c0_29], %54 {strides = array<i32>} : memref<36x256xf32, #tpu.memory_space<vmem>>, vector<4x256xf32>,
    %c0_30 = arith.constant 0 : index
    %c17_31 = arith.constant 17 : index
    %56 = vector.load %arg9[%c0_30, %c17_31] : memref<4x290xf32, #tpu.memory_space<vmem>>, vector<4x256xf32>
    %c16_32 = arith.constant 16 : index
    %c0_33 = arith.constant 0 : index
    %57 = vector.load %arg10[%c16_32, %c0_33] : memref<36x256xf32, #tpu.memory_space<vmem>>, vector<4x256xf32>
    tpu.vector_store %arg10[%c16_32, %c0_33], %56 {strides = array<i32>} : memref<36x256xf32, #tpu.memory_space<vmem>>, vector<4x256xf32>,
    %c0_34 = arith.constant 0 : index
    %c18 = arith.constant 18 : index
    %58 = vector.load %arg9[%c0_34, %c18] : memref<4x290xf32, #tpu.memory_space<vmem>>, vector<4x256xf32>
    %cst_35 = arith.constant 0.000000e+00 : f32
    %59 = vector.shape_cast %35 : vector<1x256xi1> to vector<1x256xi1>
    %60 = vector.broadcast %59 : vector<1x256xi1> to vector<4x256xi1>
    %61 = vector.broadcast %cst_35 : f32 to vector<4x256xf32>
    %62 = arith.select %60, %58, %61 : vector<4x256xi1>, vector<4x256xf32>
    %c20 = arith.constant 20 : index
    %c0_36 = arith.constant 0 : index
    %63 = vector.load %arg10[%c20, %c0_36] : memref<36x256xf32, #tpu.memory_space<vmem>>, vector<4x256xf32>
    tpu.vector_store %arg10[%c20, %c0_36], %62 {strides = array<i32>} : memref<36x256xf32, #tpu.memory_space<vmem>>, vector<4x256xf32>,
    %c0_37 = arith.constant 0 : index
    %c32 = arith.constant 32 : index
    %64 = vector.load %arg9[%c0_37, %c32] : memref<4x290xf32, #tpu.memory_space<vmem>>, vector<4x256xf32>
    %cst_38 = arith.constant 0.000000e+00 : f32
    %65 = vector.shape_cast %33 : vector<1x256xi1> to vector<1x256xi1>
    %66 = vector.broadcast %65 : vector<1x256xi1> to vector<4x256xi1>
    %67 = vector.broadcast %cst_38 : f32 to vector<4x256xf32>
    %68 = arith.select %66, %64, %67 : vector<4x256xi1>, vector<4x256xf32>
    %c24 = arith.constant 24 : index
    %c0_39 = arith.constant 0 : index
    %69 = vector.load %arg10[%c24, %c0_39] : memref<36x256xf32, #tpu.memory_space<vmem>>, vector<4x256xf32>
    tpu.vector_store %arg10[%c24, %c0_39], %68 {strides = array<i32>} : memref<36x256xf32, #tpu.memory_space<vmem>>, vector<4x256xf32>,
    %c0_40 = arith.constant 0 : index
    %c33 = arith.constant 33 : index
    %70 = vector.load %arg9[%c0_40, %c33] : memref<4x290xf32, #tpu.memory_space<vmem>>, vector<4x256xf32>
    %c28 = arith.constant 28 : index
    %c0_41 = arith.constant 0 : index
    %71 = vector.load %arg10[%c28, %c0_41] : memref<36x256xf32, #tpu.memory_space<vmem>>, vector<4x256xf32>
    tpu.vector_store %arg10[%c28, %c0_41], %70 {strides = array<i32>} : memref<36x256xf32, #tpu.memory_space<vmem>>, vector<4x256xf32>,
    %c0_42 = arith.constant 0 : index
    %c34 = arith.constant 34 : index
    %72 = vector.load %arg9[%c0_42, %c34] : memref<4x290xf32, #tpu.memory_space<vmem>>, vector<4x256xf32>
    %cst_43 = arith.constant 0.000000e+00 : f32
    %73 = vector.shape_cast %35 : vector<1x256xi1> to vector<1x256xi1>
    %74 = vector.broadcast %73 : vector<1x256xi1> to vector<4x256xi1>
    %75 = vector.broadcast %cst_43 : f32 to vector<4x256xf32>
    %76 = arith.select %74, %72, %75 : vector<4x256xi1>, vector<4x256xf32>
    %c32_44 = arith.constant 32 : index
    %c0_45 = arith.constant 0 : index
    %77 = vector.load %arg10[%c32_44, %c0_45] : memref<36x256xf32, #tpu.memory_space<vmem>>, vector<4x256xf32>
    tpu.vector_store %arg10[%c32_44, %c0_45], %76 {strides = array<i32>} : memref<36x256xf32, #tpu.memory_space<vmem>>, vector<4x256xf32>,
    %c0_46 = arith.constant 0 : index
    %c0_47 = arith.constant 0 : index
    %78 = vector.load %arg4[%c0_46, %c0_47] : memref<4x36xbf16, #tpu.memory_space<vmem>>, vector<4x36xbf16>
    %c0_48 = arith.constant 0 : index
    %c0_49 = arith.constant 0 : index
    %79 = vector.load %arg10[%c0_48, %c0_49] : memref<36x256xf32, #tpu.memory_space<vmem>>, vector<36x256xf32>
    %80 = arith.truncf %79 : vector<36x256xf32> to vector<36x256xbf16>
    %cst_50 = arith.constant dense<0.000000e+00> : vector<4x256xf32>
    %81 = tpu.matmul %78, %80, %cst_50 {dimension_numbers = #tpu.dot_dimension_numbers<[1], [0], [0], [1], [0, 0, 1, 1], [], []>} : vector<4x36xbf16>, vector<36x256xbf16>, vector<4x256xf32> -> vector<4x256xf32>
    %c0_51 = arith.constant 0 : index
    %c0_52 = arith.constant 0 : index
    %82 = vector.load %arg5[%c0_51, %c0_52] : memref<4x1xf32, #tpu.memory_space<vmem>>, vector<4x1xf32>
    %83 = vector.broadcast %82 : vector<4x1xf32> to vector<4x256xf32>
    %84 = arith.addf %81, %83 : vector<4x256xf32>
    %cst_53 = arith.constant 0.000000e+00 : f32
    %85 = vector.broadcast %cst_53 : f32 to vector<4x256xf32>
    %86 = arith.maximumf %84, %85 : vector<4x256xf32>
    %c0_54 = arith.constant 0 : index
    %c0_55 = arith.constant 0 : index
    %87 = vector.load %arg6[%c0_54, %c0_55] : memref<16x4xbf16, #tpu.memory_space<vmem>>, vector<16x4xbf16>
    %88 = arith.truncf %86 : vector<4x256xf32> to vector<4x256xbf16>
    %cst_56 = arith.constant dense<0.000000e+00> : vector<16x256xf32>
    %89 = tpu.matmul %87, %88, %cst_56 {dimension_numbers = #tpu.dot_dimension_numbers<[1], [0], [0], [1], [0, 0, 1, 1], [], []>} : vector<16x4xbf16>, vector<4x256xbf16>, vector<16x256xf32> -> vector<16x256xf32>
    %c0_57 = arith.constant 0 : index
    %c0_58 = arith.constant 0 : index
    %90 = vector.load %arg7[%c0_57, %c0_58] : memref<16x1xf32, #tpu.memory_space<vmem>>, vector<16x1xf32>
    %91 = vector.broadcast %90 : vector<16x1xf32> to vector<16x256xf32>
    %92 = arith.addf %89, %91 : vector<16x256xf32>
    %93 = arith.addf %92, %1 : vector<16x256xf32>
    %cst_59 = arith.constant 0.000000e+00 : f32
    %94 = vector.broadcast %cst_59 : f32 to vector<16x256xf32>
    %95 = arith.maximumf %93, %94 : vector<16x256xf32>
    %c0_60 = arith.constant 0 : index
    %c0_61 = arith.constant 0 : index
    %c0_62 = arith.constant 0 : index
    %96 = vector.load %arg8[%c0_60, %c0_61, %c0_62] : memref<1x16x256xf32, #tpu.memory_space<vmem>>, vector<1x16x256xf32>
    %97 = vector.shape_cast %96 : vector<1x16x256xf32> to vector<16x256xf32>
    %98 = vector.shape_cast %95 : vector<16x256xf32> to vector<1x16x256xf32>
    tpu.vector_store %arg8[%c0_60, %c0_61, %c0_62], %98 {strides = array<i32>} : memref<1x16x256xf32, #tpu.memory_space<vmem>>, vector<1x16x256xf32>,
    return
  }
  func.func @transform_0(%arg0: i32) -> (i32, i32, i32) {
    %c0_i32 = arith.constant 0 : i32
    %c0_i32_0 = arith.constant 0 : i32
    %c0_i32_1 = arith.constant 0 : i32
    return %arg0, %c0_i32, %c0_i32_0 : i32, i32, i32
  }
  func.func @transform_1(%arg0: i32) -> (i32, i32) {
    %c0_i32 = arith.constant 0 : i32
    %c0_i32_0 = arith.constant 0 : i32
    %c0_i32_1 = arith.constant 0 : i32
    return %c0_i32, %c0_i32_0 : i32, i32
  }
  func.func @transform_2(%arg0: i32) -> (i32, i32) {
    %c0_i32 = arith.constant 0 : i32
    %c0_i32_0 = arith.constant 0 : i32
    %c0_i32_1 = arith.constant 0 : i32
    return %c0_i32, %c0_i32_0 : i32, i32
  }
  func.func @transform_3(%arg0: i32) -> (i32, i32) {
    %c0_i32 = arith.constant 0 : i32
    %c0_i32_0 = arith.constant 0 : i32
    %c0_i32_1 = arith.constant 0 : i32
    return %c0_i32, %c0_i32_0 : i32, i32
  }
  func.func @transform_4(%arg0: i32) -> (i32, i32) {
    %c0_i32 = arith.constant 0 : i32
    %c0_i32_0 = arith.constant 0 : i32
    %c0_i32_1 = arith.constant 0 : i32
    return %c0_i32, %c0_i32_0 : i32, i32
  }
  func.func @transform_5(%arg0: i32) -> (i32, i32) {
    %c0_i32 = arith.constant 0 : i32
    %c0_i32_0 = arith.constant 0 : i32
    %c0_i32_1 = arith.constant 0 : i32
    return %c0_i32, %c0_i32_0 : i32, i32
  }
  func.func @transform_6(%arg0: i32) -> (i32, i32) {
    %c0_i32 = arith.constant 0 : i32
    %c0_i32_0 = arith.constant 0 : i32
    %c0_i32_1 = arith.constant 0 : i32
    return %c0_i32, %c0_i32_0 : i32, i32
  }
  func.func @transform_7(%arg0: i32) -> (i32, i32, i32) {
    %c0_i32 = arith.constant 0 : i32
    %c0_i32_0 = arith.constant 0 : i32
    %c0_i32_1 = arith.constant 0 : i32
    return %arg0, %c0_i32, %c0_i32_0 : i32, i32, i32
  }
}

</mosaic_0001>

<bundles_post_ra>
// kernel: tpu_custom_call.1
= control target key start
LH: loop header
LB: loop body
LE: loop exit
PB: predicated region body
PF: predicated region fallthrough
CT: control target
= control target key end

     0   :  { %12 = vsyncpa [#allocation5], 0  ;;  %s1353_s0 = inlined_call_operand.hbm [shape: f32[2,16,256], index: 0, kind: input, shape index: {}]   ;;  %s1354_s1 = inlined_call_operand.vmem [shape: bf16[4,16], index: 1, kind: input, shape index: {}]   ;;  %s1355_s2 = inlined_call_operand.vmem [shape: f32[4,1], index: 2, kind: input, shape index: {}]   ;;  %s1356_s3 = inlined_call_operand.vmem [shape: bf16[4,36], index: 3, kind: input, shape index: {}]   ;;  %s1357_s4 = inlined_call_operand.vmem [shape: f32[4,1], index: 4, kind: input, shape index: {}]   ;;  %s1358_s5 = inlined_call_operand.vmem [shape: bf16[16,4], index: 5, kind: input, shape index: {}]   ;;  %s1359_s6 = inlined_call_operand.vmem [shape: f32[16,1], index: 6, kind: input, shape index: {}]   ;;  %s1360_s7 = inlined_call_operand.hbm [shape: f32[2,16,256], index: 7, kind: output, shape index: {}]  }
   0x1   :  { %14 = vsyncpa [#allocation5 + $0x1], 0 }
   0x2   :  { %15 = vsyncpa [#allocation6], 0 }
   0x3   :  { %17 = vsyncpa [#allocation6 + $0x1], 0  ;;  %s1090_s24 = smov 0   ;;  %s1092_s25 = smov 0  }
   0x4   :  { %s1094_s26 = smov 0   ;;  %s1096_s27 = smov 0  }
   0x5 LB: > { %s1111_s28 = sadd.s32 4294967295, %s1033_s27   ;;  %s846_s29 = sadd.s32 4294967294, %s1033_s27   ;;  %s1033_s27 = sphi %s1096_s27, %s1380_s27   ;;  %s1029_s26 = sphi %s1094_s26, %s1379_s26   ;;  %s1025_s25 = sphi %s1092_s25, %s1378_s25   ;;  %s1021_s24 = sphi %s1090_s24, %s1377_s24  }
   0x6   : > { %s1115_s30 = sadd.s32 1, %s1033_s27   ;;  %s30_s8 = sadd.s32 1, %s1029_s26 }
   0x7   : > { %s27_s9 = ssub.s32 %s1033_s27, %s1115_s30  ;;  %p37_p0 = scmp.ne.s32.totalorder %s1029_s26, %s1025_s25 }
   0x8   : > { %p28_p1 = scmp.eq.s32.totalorder %s27_s9, 0  ;;  %p38_p2 = scmp.eq.s32.totalorder %s1033_s27, 0 }
   0x9   : > { %p43_p3 = scmp.ne.s32.totalorder %s1025_s25, %s1021_s24  ;;  %p44_p4 = scmp.eq.s32.totalorder %s1111_s28, 0 }
   0xa   : > { %s1127_s10 = scalar_select %p28_p1, %s1029_s26, %s30_s8  }
   0xb   : > { %p1129_p5 = por %p38_p2, %p37_p0  ;;  %p1133_p6 = por %p44_p4, %p43_p3 }
   0xc   : > { %1361 = sst [smem:[#allocation10_spill]] %s1127_s10  ;;  %p193_p7 = scmp.eq.s32.totalorder %s1111_s28, 1 }
   0xd   : > { %p199_p8 = scmp.eq.s32.totalorder %s846_s29, 1  ;;  %p885_p10 = scmp.lt.s32.totalorder %s1033_s27, 2 }
   0xe   : > { %p1140_p11 = por %p193_p7, %p37_p0  ;;  %s237_s15 = sand.u32 1, %s1029_s26  }
   0xf   : > { %p1144_p12 = por %p199_p8, %p43_p3  ;;  %s870_s16 = sshll.u32 %s1033_s27, 5 }
  0x10   : > { %s849_s17 = sshll.u32 %s237_s15, 5  ;;  %s246_s20 = scalar_lea.hbm %s1353_s0, %s870_s16 }
  0x11   : > { %s247_s21 = sshll.u32 %s246_s20, 4  ;;  %s241_s22 = scalar_lea.vmem [#allocation4], %s849_s17  ;;  %s248_s21 = int_to_ptr.hbm [resolvable:$true] %s247_s21 }
  0x12   : > { %s249_s23 = sshll.u32 %s241_s22, 4  ;;  %p1155_p13 = pnand %p885_p10, %p1129_p5  ;;  %s250_s23 = int_to_ptr.vmem [resolvable:$true] %s249_s23 }
  0x13   : > { %p852_p0 = scmp.ge.s32.totalorder %s1033_s27, 1  ;;  %p257_p1 = scmp.lt.s32.totalorder %s1033_s27, 3 }
  0x14   : > { %s238_s8 = scalar_lea.sflag [#allocation5], %s237_s15  ;;  %s937_s9 = sshra.s32 %s248_s21, 4  ;;  %s938_s9 = int_to_ptr.hbm [resolvable:$true] %s937_s9 }
  0x15   : > { %s939_s10 = scalar_lea.hbm %s938_s9, 32  ;;  %p941_p3 = pneg %p1155_p13 }
  0x16   : > { %p940_p2 = scmp.ne.s32.totalorder %s938_s9, %s939_s10  ;;  %s944_s11 = scalar_lea.hbm %s1353_s0, 64 }
  0x17   : > { %p945_p5 = scmp.lt.s32.totalorder %s938_s9, %s1353_s0  ;;  %p946_p8 = scmp.lt.s32.totalorder %s944_s11, %s939_s10 }
  0x18   : > { %p942_p4 = pnand %p941_p3, %p940_p2 }
  0x19   : > { %p947_p10 = por %p946_p8, %p945_p5 }
  0x1a   : > { %p943_p7 = pneg %p942_p4 }
  0x1c   : > { %p948_p9 = pnand %p947_p10, %p943_p7 }
  0x1e   : > { %951 = shalt.err (!%p948_p9)
}
  0x1f   : > { %s1035_s15 = smov 256   ;;  %s1036_s20 = smov 16  }
  0x20   : > { %880 = dma.hbm_to_vmem [thread:$0]  (!%p1155_p13), %s248_s21, 512, %s250_s23, %s238_s8, %s1035_s15, %s1035_s15, %s1036_s20  }
  0x21   : > { %p258_p2 = pnand %p852_p0, %p257_p1 }
  0x22   : > { %s1176_s22 = sand.u32 (!%p258_p2), 1, %s1025_s25  }
  0x23   : > { %261 = sbr.rel (%p258_p2) target bundleno = 818 (0x332), region = 48  ;;  %s853_s10 = sshll.u32 (!%p258_p2), %s1176_s22, 5 }
  0x24   : > { %s264_s9 = scalar_lea.sflag (!%p258_p2), [#allocation5], %s1176_s22  ;;  %s267_s16 = scalar_lea.vmem (!%p258_p2), [#allocation4], %s853_s10 }
  0x28   : > { %1012 = dma.done.wait (%p1133_p6), %s264_s9, 512  }
  0x29   : > { %1014 = vsyncadd (%p1133_p6), %s264_s9, 4294966784  ;;  %v1037_v0 = vmov 0   ;;  %v1186_v1 = vld [vmem:[%s267_s16] sm:$0xff]  ;;  %v1188_v2 = vld [vmem:[%s267_s16 + $0x10] sm:$0xff]  ;;  %vm313_vm0 = vcmask 130048   ;;  %vm345_vm1 = vcmask 134144   ;;  %v366_v23 = vlaneseq }
  0x2a   : > { %934 = vset.pattern.permute.xlu0 %v1037_v0  ;;  %935 = vset.pattern.permute.xlu2 %v1037_v0  ;;  %v1190_v3 = vld [vmem:[%s267_s16 + $0x8] sm:$0xff]  ;;  %v305_v4 = vpack.c.bf16 %v1188_v2, %v1186_v1  ;;  %v1194_v5 = vld [vmem:[%s267_s16 + $0x18] sm:$0xff]  ;;  %vm347_vm2 = vcmask 273544   ;;  %v1038_v9 = vmov 0.0   ;;  %vm352_vm3 = vcmask 1043456   ;;  %s1039_s8 = smov 17  }
  0x2b   : > { %936 = vset.pattern.permute.xlu1 %v1037_v0  ;;  %v307_v6 = vld [vmem:[%s1355_s2] sm:$0xf]  ;;  %v306_v7 = vpack.c.bf16 %v1194_v5, %v1190_v3  ;;  %346 = vst.msk [vmem:[#allocation2] sm:$0xf] %vm345_vm1, %v1038_v9  ;;  %vm361_vm4 = vcmask 1043592   ;;  %vm362_vm5 = vcmask 1047556  }
  0x2c   : > { %310 = vperm.xlu0 %934, %v307_v6   ;;  %324 = vmatpush.bf16.msra.mxu0 %v305_v4  ;;  %v304_v8 = vld [vmem:[%s1354_s1] sm:$0x3]  ;;  %348 = vst.msk [vmem:[#allocation2 + $0x8] sm:$0xf] %vm347_vm2, %v1038_v9  ;;  %vm357_vm6 = vcmask 138240   ;;  %vm363_vm7 = vmor %vm362_vm5, %vm361_vm4  ;;  %v1206_v25 = vand.u32 127, %v366_v23 }
  0x2d   : > { %337 = vmatpush.bf16.msra.mxu1 %v306_v7  ;;  %s1040_s17 = smov 126   ;;  %s1041_s11 = smov 112   ;;  %v690_v7 = vld [vmem:[%s1359_s6] sm:$0xff]  ;;  %vm456_vm10 = vcmask 1031168   ;;  %vm481_vm12 = vcmask 916480   ;;  %vm512_vm13 = vcmask 908288  }
  0x2e   : > { %v1209_v26 = vadd.s32 128, %v1206_v25  ;;  %v373_v29 = vand.u32 15, %v1206_v25  ;;  %s1042_s18 = smov 111   ;;  %s1043_s19 = smov 110   ;;  %vm535_vm14 = vcmask 900096   ;;  %vm429_vm2 = vcmask 1039360  }
  0x2f   : > { %855 = vmatmul.msk.bf16.vlgmr.msra.gmra.mxu0 %vm313_vm0, %v304_v8  ;;  %s1044_s15 = smov 96   ;;  %s1045_s20 = smov 95   ;;  %v641_v32 = vld [vmem:[%s1357_s4] sm:$0xf]  ;;  %vm651_vm4 = vcmask 1041408   ;;  %vm647_vm5 = vcmask 293888  }
  0x30   : > { %856 = vmatmul.msk.bf16.vlgmr.msra.gmra.mxu1 %vm313_vm0, %v304_v8  ;;  %v380_v30 = vand.u32 15, %v1209_v26  ;;  %vm1218_vm8 = vcmp.ne.s32.totalorder %v373_v29, 0  ;;  %s1046_s9 = smov 94   ;;  %s1047_s16 = smov 127   ;;  %vm1260_vm11 = vcmp.ne.s32.totalorder %v373_v29, 15  ;;  %vm566_vm0 = vcmask 785408  }
  0x32   : > { %vm1224_vm9 = vcmp.ne.s32.totalorder %v380_v30, 0  ;;  %vm1276_vm15 = vcmp.ne.s32.totalorder %v380_v30, 15 }
  0x9e   : > { %v311_v10 = vpop.permute.xlu0 %310 }
  0xac   : > { %v326_v11 = vpop.f32.mrf.mxu0 }
  0xad   : > { %v339_v12 = vpop.f32.mrf.mxu1  ;;  %v327_v13 = vadd.f32 %v326_v11, %v311_v10 }
  0xae   : > { %v340_v14 = vadd.f32 %v339_v12, %v311_v10 }
  0xaf   : > { %v343_v16 = vmax.f32 %v327_v13, 0.0 }
  0xb0   : > { %v344_v15 = vmax.f32 %v340_v14, 0.0 }
  0xb2   : > { %v351_v17 = vrot.slane %v344_v15, 4 }
  0xb4   : > { %v328_v18 = vpop.f32.mrf.mxu0  ;;  %v353_v19 = vsel %vm352_vm3, %v343_v16, %v351_v17  ;;  %vm615_vm3 = vcmask 769024  }
  0xb5   : > { %v341_v20 = vpop.f32.mrf.mxu1  ;;  %354 = vrot.lane.b32.xlu0 %v353_v19, %s1039_s8 }
 0x127   : > { %v355_v21 = vpop.permute.xlu0 %354 }
 0x128   : > { %v356_v22 = vrot.slane %v355_v21, 4 }
 0x12a   : > { %v358_v24 = vsel %vm357_vm6, %v356_v22, %v355_v21  ;;  %365 = vst.msk [vmem:[#allocation2 + $0x8] sm:$0xf] %vm345_vm1, %v356_v22  ;;  %vm592_vm1 = vcmask 777216   ;;  %vm707_vm6 = vcmask 31744  }
 0x12b   : > { %364 = vst.msk [vmem:[#allocation2] sm:$0xff] %vm363_vm7, %v358_v24 }
 0x131   : > { %v413_v27 = vld [vmem:[#allocation2 + $0x8] sm:$0xf] }
 0x132   : > { %v1211_v28 = vld [vmem:[#allocation2] sm:$0xff]  ;;  %419 = vst [vmem:[#allocation1 + $0x11] ss:$2 sm:$0xff] %v413_v27  ;;  %v437_v36 = vld [vmem:[#allocation2 + $0x8] sm:$0xf] }
 0x133   : > { %403 = vst [vmem:[#allocation1] ss:$2 sm:$0xff] %v1211_v28  ;;  %v466_v39 = vld [vmem:[#allocation2 + $0x8] sm:$0xf] }
 0x134   : > { %v497_v43 = vld [vmem:[#allocation2 + $0x8] sm:$0xf] }
 0x135   : > { %v520_v47 = vld [vmem:[#allocation2 + $0x8] sm:$0xf] }
 0x136   : > { %v551_v51 = vld [vmem:[#allocation2 + $0x8] sm:$0xf] }
 0x137   : > { %v576_v55 = vld [vmem:[#allocation2 + $0x8] sm:$0xf] }
 0x138   : > { %v600_v59 = vld [vmem:[#allocation2 + $0x8] sm:$0xf] }
 0x139   : > { %v1228_v33 = vld.sshfl [vmem:[#allocation1 + $0x10] sm:$0xff pattern:$0x75316420] }
 0x13a   : > { %v404_v34 = vld.sshfl [vmem:[#allocation1] sm:$0xff pattern:$0x75316420]  ;;  %v405_v35 = vld.sshfl [vmem:[#allocation1 + $0x8] sm:$0xff pattern:$0x75316420] }
 0x13b   : > { %417 = vst [vmem:[#allocation1 + $0x1] ss:$2 sm:$0xff] %v1211_v28  ;;  %v409_v37 = vsel %vm1224_vm9, %v405_v35, 0.0  ;;  %v408_v38 = vsel %vm1218_vm8, %v404_v34, 0.0 }
 0x13c   : > { %446 = vst [vmem:[#allocation1 + $0x10] ss:$2 sm:$0xff] %v437_v36 }
 0x13d   : > { %411 = vst [vmem:[#allocation3] sm:$0xf] %v409_v37 }
 0x13e   : > { %410 = vst [vmem:[#allocation3 + $0x30] sm:$0xf] %v408_v38 }
 0x142   : > { %v1235_v40 = vld.sshfl [vmem:[#allocation1] sm:$0xff pattern:$0x75316420]  ;;  %v1237_v41 = vld.sshfl [vmem:[#allocation1 + $0x8] sm:$0xff pattern:$0x75316420] }
 0x143   : > { %v1239_v42 = vld.sshfl [vmem:[#allocation1 + $0x10] sm:$0xff pattern:$0x75316420]  ;;  %444 = vst [vmem:[#allocation1] ss:$2 sm:$0xff] %v1211_v28 }
 0x144   : > { %471 = vst [vmem:[#allocation1 + $0x10] ss:$2 sm:$0xff] %v466_v39 }
 0x14a   : > { %v448_v44 = vld.sshfl [vmem:[#allocation1 + $0x8] sm:$0xff pattern:$0x75316420]  ;;  %v447_v45 = vld.sshfl [vmem:[#allocation1] sm:$0xff pattern:$0x75316420] }
 0x14b   : > { %v474_v46 = vld.sshfl [vmem:[#allocation1 + $0x10] sm:$0xff pattern:$0x75316420]  ;;  %452 = vrot.lane.b32.xlu0 %v448_v44, %s1040_s17  ;;  %450 = vrot.lane.b32.xlu2 %v447_v45, %s1040_s17  ;;  %469 = vst [vmem:[#allocation1] ss:$2 sm:$0xff] %v1211_v28 }
 0x14c   : > { %479 = vrot.lane.b32.xlu1 %v474_v46, %s1041_s11  ;;  %502 = vst [vmem:[#allocation1 + $0x10] ss:$2 sm:$0xff] %v497_v43 }
 0x152   : > { %v473_v48 = vld.sshfl [vmem:[#allocation1 + $0x8] sm:$0xff pattern:$0x75316420]  ;;  %v472_v49 = vld.sshfl [vmem:[#allocation1] sm:$0xff pattern:$0x75316420] }
 0x153   : > { %v505_v50 = vld.sshfl [vmem:[#allocation1 + $0x10] sm:$0xff pattern:$0x75316420]  ;;  %477 = vrot.lane.b32.xlu0 %v473_v48, %s1041_s11  ;;  %475 = vrot.lane.b32.xlu2 %v472_v49, %s1041_s11  ;;  %500 = vst [vmem:[#allocation1] ss:$2 sm:$0xff] %v1211_v28 }
 0x154   : > { %510 = vrot.lane.b32.xlu1 %v505_v50, %s1042_s18  ;;  %525 = vst [vmem:[#allocation1 + $0x10] ss:$2 sm:$0xff] %v520_v47 }
 0x15a   : > { %v504_v52 = vld.sshfl [vmem:[#allocation1 + $0x8] sm:$0xff pattern:$0x75316420]  ;;  %v503_v53 = vld.sshfl [vmem:[#allocation1] sm:$0xff pattern:$0x75316420] }
 0x15b   : > { %v528_v54 = vld.sshfl [vmem:[#allocation1 + $0x10] sm:$0xff pattern:$0x75316420]  ;;  %508 = vrot.lane.b32.xlu0 %v504_v52, %s1042_s18  ;;  %506 = vrot.lane.b32.xlu2 %v503_v53, %s1042_s18  ;;  %523 = vst [vmem:[#allocation1] ss:$2 sm:$0xff] %v1211_v28  ;;  %s987_s18 = scalar_lea.hbm %s1360_s7, 64 }
 0x15c   : > { %533 = vrot.lane.b32.xlu1 %v528_v54, %s1043_s19  ;;  %556 = vst [vmem:[#allocation1 + $0x10] ss:$2 sm:$0xff] %v551_v51 }
 0x162   : > { %v527_v56 = vld.sshfl [vmem:[#allocation1 + $0x8] sm:$0xff pattern:$0x75316420]  ;;  %v526_v57 = vld.sshfl [vmem:[#allocation1] sm:$0xff pattern:$0x75316420] }
 0x163   : > { %v559_v58 = vld.sshfl [vmem:[#allocation1 + $0x10] sm:$0xff pattern:$0x75316420]  ;;  %531 = vrot.lane.b32.xlu0 %v527_v56, %s1043_s19  ;;  %529 = vrot.lane.b32.xlu2 %v526_v57, %s1043_s19  ;;  %554 = vst [vmem:[#allocation1] ss:$2 sm:$0xff] %v1211_v28 }
 0x164   : > { %564 = vrot.lane.b32.xlu1 %v559_v58, %s1044_s15  ;;  %582 = vst [vmem:[#allocation1 + $0x11] ss:$2 sm:$0xff] %v576_v55 }
 0x16a   : > { %v558_v60 = vld.sshfl [vmem:[#allocation1 + $0x8] sm:$0xff pattern:$0x75316420]  ;;  %v557_v61 = vld.sshfl [vmem:[#allocation1] sm:$0xff pattern:$0x75316420] }
 0x16b   : > { %v585_v62 = vld.sshfl [vmem:[#allocation1 + $0x10] sm:$0xff pattern:$0x75316420]  ;;  %562 = vrot.lane.b32.xlu0 %v558_v60, %s1044_s15  ;;  %560 = vrot.lane.b32.xlu2 %v557_v61, %s1044_s15  ;;  %580 = vst [vmem:[#allocation1 + $0x1] ss:$2 sm:$0xff] %v1211_v28 }
 0x16c   : > { %590 = vrot.lane.b32.xlu1 %v585_v62, %s1045_s20  ;;  %605 = vst [vmem:[#allocation1 + $0x10] ss:$2 sm:$0xff] %v600_v59 }
 0x172   : > { %v584_v63 = vld.sshfl [vmem:[#allocation1 + $0x8] sm:$0xff pattern:$0x75316420]  ;;  %v583_v0 = vld.sshfl [vmem:[#allocation1] sm:$0xff pattern:$0x75316420] }
 0x173   : > { %v608_v4 = vld.sshfl [vmem:[#allocation1 + $0x10] sm:$0xff pattern:$0x75316420]  ;;  %588 = vrot.lane.b32.xlu0 %v584_v63, %s1045_s20  ;;  %603 = vst [vmem:[#allocation1] ss:$2 sm:$0xff] %v1211_v28 }
 0x174   : > { %613 = vrot.lane.b32.xlu2 %v608_v4, %s1046_s9 }
 0x17a   : > { %v606_v6 = vld.sshfl [vmem:[#allocation1] sm:$0xff pattern:$0x75316420]  ;;  %v607_v8 = vld.sshfl [vmem:[#allocation1 + $0x8] sm:$0xff pattern:$0x75316420] }
 0x17b   : > { %425 = vrot.lane.b32.xlu0 %v1237_v41, %s1047_s16  ;;  %609 = vrot.lane.b32.xlu1 %v606_v6, %s1046_s9 }
 0x17c   : > { %586 = vrot.lane.b32.xlu2 %v583_v0, %s1045_s20  ;;  %s298_s20 = scalar_lea.vmem [#allocation7], %s853_s10 }
 0x17d   : > { %s770_s12 = sshll.u32 %s298_s20, 4  ;;  %s771_s12 = int_to_ptr.vmem [resolvable:$true] %s770_s12 }
 0x183   : > { %694 = vperm.xlu0 %934, %v690_v7   ;;  %611 = vrot.lane.b32.xlu1 %v607_v8, %s1046_s9  ;;  %s872_s9 = sshll.u32 %s1111_s28, 5  ;;  %s758_s28 = scalar_lea.sflag [#allocation6], %s1176_s22 }
 0x184   : > { %423 = vrot.lane.b32.xlu2 %v1235_v40, %s1047_s16  ;;  %s769_s23 = scalar_lea.hbm %s1360_s7, %s872_s9 }
 0x185   : > { %s772_s10 = sshll.u32 %s769_s23, 4  ;;  %s773_s10 = int_to_ptr.hbm [resolvable:$true] %s772_s10 }
 0x186   : > { %s981_s29 = sshra.s32 %s773_s10, 4  ;;  %s982_s29 = int_to_ptr.hbm [resolvable:$true] %s981_s29 }
 0x187   : > { %s983_s8 = scalar_lea.hbm %s982_s29, 32  ;;  %p988_p0 = scmp.lt.s32.totalorder %s982_s29, %s1360_s7 }
 0x188   : > { %p984_p6 = scmp.ne.s32.totalorder %s982_s29, %s983_s8  ;;  %p989_p1 = scmp.lt.s32.totalorder %s987_s18, %s983_s8 }
 0x18a   : > { %p985_p9 = pnand %p984_p6, %p1140_p11  ;;  %p990_p3 = por %p989_p1, %p988_p0 }
 0x18b   : > { %454 = vrot.lane.b32.xlu1 %v1239_v42, %s1040_s17 }
 0x18c   : > { %644 = vperm.xlu2 %935, %v641_v32   ;;  %p986_p13 = pneg %p985_p9 }
 0x18e   : > { %p991_p4 = pnand %p990_p3, %p986_p13 }
 0x193   : > { %427 = vrot.lane.b32.xlu1 %v1228_v33, %s1047_s16 }
 0x1a5   : > { %v451_v9 = vpop.permute.xlu2 %450 }
 0x1ad   : > { %v476_v10 = vpop.permute.xlu2 %475 }
 0x1b5   : > { %v507_v11 = vpop.permute.xlu2 %506 }
 0x1bd   : > { %v1264_v13 = vpop.permute.xlu0 %452  ;;  %v530_v17 = vpop.permute.xlu2 %529 }
 0x1be   : > { %v480_v14 = vpop.permute.xlu1 %479  ;;  %v457_v15 = vsel %vm456_vm10, %v451_v9, %v1264_v13 }
 0x1bf   : > { %v461_v16 = vsel %vm1260_vm11, %v457_v15, 0.0 }
 0x1c0   : > { %463 = vst [vmem:[#allocation3 + $0x18] sm:$0xf] %v461_v16 }
 0x1c5   : > { %v478_v18 = vpop.permute.xlu0 %477  ;;  %v561_v28 = vpop.permute.xlu2 %560 }
 0x1c6   : > { %v482_v19 = vsel %vm481_vm12, %v476_v10, %v478_v18  ;;  %v483_v20 = vsel %vm481_vm12, %v478_v18, %v480_v14  ;;  %v511_v21 = vpop.permute.xlu1 %510 }
 0x1c7   : > { %v486_v22 = vsel %vm1218_vm8, %v482_v19, 0.0  ;;  %v487_v23 = vsel %vm1224_vm9, %v483_v20, 0.0 }
 0x1c8   : > { %v490_v24 = vrot.slane %v486_v22, 4  ;;  %v491_v25 = vrot.slane %v487_v23, 4 }
 0x1ca   : > { %494 = vst [vmem:[#allocation3 + $0x18] sm:$0xf0] %v490_v24 }
 0x1cb   : > { %495 = vst [vmem:[#allocation3 + $0x10] sm:$0xf0] %v491_v25  ;;  %v691_v25 = vld [vmem:[%s1359_s6 + $0x8] sm:$0xff] }
 0x1cc   : > { %699 = vperm.xlu1 %936, %v691_v25  }
 0x1cd   : > { %v509_v27 = vpop.permute.xlu0 %508 }
 0x1ce   : > { %v513_v29 = vsel %vm512_vm13, %v507_v11, %v509_v27  ;;  %v514_v33 = vsel %vm512_vm13, %v509_v27, %v511_v21  ;;  %v534_v34 = vpop.permute.xlu1 %533  ;;  %v614_v41 = vpop.permute.xlu2 %613  ;;  %v624_v21 = vld [vmem:[%s1356_s3] sm:$0x3] }
 0x1cf   : > { %517 = vst [vmem:[#allocation3 + $0x48] sm:$0xf] %v513_v29 }
 0x1d0   : > { %518 = vst [vmem:[#allocation3 + $0x28] sm:$0xf] %v514_v33 }
 0x1d1   : > { %v627_v19 = vld [vmem:[#allocation3 + $0x18] sm:$0xff] }
 0x1d5   : > { %v532_v36 = vpop.permute.xlu0 %531 }
 0x1d6   : > { %v536_v37 = vsel %vm535_vm14, %v530_v17, %v532_v36  ;;  %v537_v38 = vsel %vm535_vm14, %v532_v36, %v534_v34  ;;  %v565_v44 = vpop.permute.xlu1 %564  ;;  %v587_v48 = vpop.permute.xlu2 %586 }
 0x1d7   : > { %v540_v39 = vsel %vm1260_vm11, %v536_v37, 0.0  ;;  %v541_v40 = vsel %vm1276_vm15, %v537_v38, 0.0  ;;  %v871_v38 = vld [vmem:[%s1358_s5] sm:$0xff] }
 0x1d8   : > { %v544_v42 = vrot.slane %v540_v39, 4  ;;  %v545_v43 = vrot.slane %v541_v40, 4 }
 0x1da   : > { %548 = vst [vmem:[#allocation3 + $0x48] sm:$0xf0] %v544_v42 }
 0x1db   : > { %549 = vst [vmem:[#allocation3 + $0x28] sm:$0xf0] %v545_v43 }
 0x1dd   : > { %v563_v26 = vpop.permute.xlu0 %562 }
 0x1de   : > { %v567_v30 = vsel %vm566_vm0, %v561_v28, %v563_v26  ;;  %v568_v45 = vsel %vm566_vm0, %v563_v26, %v565_v44  ;;  %v591_v49 = vpop.permute.xlu1 %590  ;;  %v424_v53 = vpop.permute.xlu2 %423 }
 0x1df   : > { %v571_v46 = vsel %vm1218_vm8, %v567_v30, 0.0  ;;  %v572_v47 = vsel %vm1224_vm9, %v568_v45, 0.0 }
 0x1e0   : > { %573 = vst [vmem:[#allocation3 + $0x8] sm:$0xf] %v571_v46 }
 0x1e1   : > { %574 = vst [vmem:[#allocation3 + $0x20] sm:$0xf] %v572_v47  ;;  %v629_v12 = vld [vmem:[#allocation3 + $0x48] sm:$0xff] }
 0x1e2   : > { %v630_v15 = vld [vmem:[#allocation3 + $0x28] sm:$0xff] }
 0x1e5   : > { %v589_v50 = vpop.permute.xlu0 %588 }
 0x1e6   : > { %v593_v51 = vsel %vm592_vm1, %v587_v48, %v589_v50  ;;  %v594_v52 = vsel %vm592_vm1, %v589_v50, %v591_v49  ;;  %v645_v27 = vpop.permute.xlu2 %644 }
 0x1e7   : > { %597 = vst [vmem:[#allocation3 + $0x8] sm:$0xf0] %v593_v51 }
 0x1e8   : > { %598 = vst [vmem:[#allocation3 + $0x20] sm:$0xf0] %v594_v52 }
 0x1ed   : > { %v426_v54 = vpop.permute.xlu0 %425  ;;  %v610_v55 = vpop.permute.xlu1 %609 }
 0x1ee   : > { %v430_v31 = vsel %vm429_vm2, %v424_v53, %v426_v54  ;;  %v631_v9 = vld [vmem:[#allocation3 + $0x8] sm:$0xff] }
 0x1ef   : > { %434 = vst [vmem:[#allocation3 + $0x30] sm:$0xf0] %v430_v31  ;;  %v632_v11 = vld [vmem:[#allocation3 + $0x20] sm:$0xff] }
 0x1f0   : > { %v638_v17 = vpack.c.bf16 %v632_v11, %v630_v15 }
 0x1f5   : > { %v612_v56 = vpop.permute.xlu1 %611  ;;  %v695_v44 = vpop.permute.xlu0 %694 }
 0x1f6   : > { %v616_v57 = vsel %vm615_vm3, %v610_v55, %v612_v56  ;;  %v617_v58 = vsel %vm615_vm3, %v612_v56, %v614_v41  ;;  %v625_v18 = vld [vmem:[#allocation3 + $0x30] sm:$0xff] }
 0x1f7   : > { %v620_v59 = vsel %vm1260_vm11, %v616_v57, 0.0  ;;  %v621_v60 = vsel %vm1276_vm15, %v617_v58, 0.0  ;;  %v635_v20 = vpack.c.bf16 %v627_v19, %v625_v18 }
 0x1f8   : > { %622 = vst [vmem:[#allocation3 + $0x40] sm:$0xf] %v620_v59 }
 0x1f9   : > { %623 = vst [vmem:[#allocation3 + $0x38] sm:$0xf] %v621_v60 }
 0x1fd   : > { %v455_v61 = vpop.permute.xlu1 %454 }
 0x1fe   : > { %v458_v62 = vsel %vm456_vm10, %v1264_v13, %v455_v61  ;;  %v637_v13 = vpack.c.bf16 %v631_v9, %v629_v12 }
 0x1ff   : > { %v462_v63 = vsel %vm1276_vm15, %v458_v62, 0.0  ;;  %v633_v0 = vld [vmem:[#allocation3 + $0x40] sm:$0xf] }
 0x200   : > { %464 = vst [vmem:[#allocation3 + $0x10] sm:$0xf] %v462_v63  ;;  %v639_v4 = vpack.c.bf16 %v633_v0, %v633_v0  ;;  %v634_v6 = vld [vmem:[#allocation3 + $0x38] sm:$0xf] }
 0x201   : > { %v640_v7 = vpack.c.bf16 %v634_v6, %v634_v6 }
 0x202   : > { %v653_v8 = vsel %vm651_vm4, %v639_v4, 0 }
 0x203   : > { %663 = vmatpush.bf16.msra.mxu2 %v653_v8  ;;  %v656_v10 = vsel %vm651_vm4, %v640_v7, 0 }
 0x204   : > { %676 = vmatpush.bf16.msra.mxu3 %v656_v10 }
 0x205   : > { %v428_v14 = vpop.permute.xlu1 %427 }
 0x206   : > { %v431_v16 = vsel %vm429_vm2, %v426_v54, %v428_v14 }
 0x207   : > { %435 = vst [vmem:[#allocation3] sm:$0xf0] %v431_v16  ;;  %664 = vmatpush.bf16.msra.mxu2 %v637_v13  ;;  %v628_v23 = vld [vmem:[#allocation3 + $0x10] sm:$0xff] }
 0x208   : > { %677 = vmatpush.bf16.msra.mxu3 %v638_v17 }
 0x20b   : > { %665 = vmatpush.bf16.msra.mxu2 %v635_v20 }
 0x20e   : > { %857 = vmatmul.msk.bf16.vlgmr.msra.gmra.mxu2 %vm647_vm5, %v624_v21  ;;  %v626_v22 = vld [vmem:[#allocation3] sm:$0xff] }
 0x20f   : > { %v636_v24 = vpack.c.bf16 %v628_v23, %v626_v22 }
 0x211   : > { %678 = vmatpush.bf16.msra.mxu3 %v636_v24 }
 0x214   : > { %858 = vmatmul.msk.bf16.vlgmr.msra.gmra.mxu3 %vm647_vm5, %v624_v21 }
 0x23e   : > { %v700_v48 = vpop.permute.xlu1 %699 }
 0x291   : > { %v667_v28 = vpop.f32.mrf.mxu2 }
 0x292   : > { %v668_v29 = vadd.f32 %v667_v28, %v645_v27 }
 0x294   : > { %v684_v33 = vmax.f32 %v668_v29, 0.0 }
 0x296   : > { %v688_v34 = vpack.c.bf16 %v684_v33, %v684_v33 }
 0x297   : > { %v680_v35 = vpop.f32.mrf.mxu3 }
 0x298   : > { %v681_v36 = vadd.f32 %v680_v35, %v645_v27  ;;  %v712_v37 = vsel %vm651_vm4, %v688_v34, 0 }
 0x299   : > { %v669_v39 = vpop.f32.mrf.mxu2  ;;  %724 = vmatpush.bf16.msrb.mxu0 %v712_v37 }
 0x29a   : > { %v685_v40 = vmax.f32 %v681_v36, 0.0 }
 0x29c   : > { %v689_v41 = vpack.c.bf16 %v685_v40, %v685_v40  ;;  %863 = vmatmul.msk.bf16.vlgmr.msrb.gmra.mxu0 %vm707_vm6, %v871_v38 }
 0x29e   : > { %v715_v42 = vsel %vm651_vm4, %v689_v41, 0 }
 0x29f   : > { %v682_v43 = vpop.f32.mrf.mxu3  ;;  %738 = vmatpush.bf16.msrb.mxu1 %v715_v42 }
 0x2a2   : > { %864 = vmatmul.msk.bf16.vlgmr.msrb.gmra.mxu1 %vm707_vm6, %v871_v38 }
 0x319   : > { %v726_v26 = vpop.f32.mrf.mxu0 }
 0x31a   : > { %v727_v30 = vadd.f32 %v726_v26, %v695_v44 }
 0x31c   : > { %v745_v45 = vadd.f32 %v727_v30, %v1186_v1 }
 0x31e   : > { %v749_v46 = vmax.f32 %v745_v45, 0.0 }
 0x31f   : > { %v740_v47 = vpop.f32.mrf.mxu1 }
 0x320   : > { %753 = vst [vmem:[%s298_s20] sm:$0xff] %v749_v46  ;;  %v741_v49 = vadd.f32 %v740_v47, %v695_v44 }
 0x321   : > { %v728_v50 = vpop.f32.mrf.mxu0 }
 0x322   : > { %v746_v51 = vadd.f32 %v741_v49, %v1190_v3  ;;  %v729_v52 = vadd.f32 %v728_v50, %v700_v48 }
 0x324   : > { %v750_v53 = vmax.f32 %v746_v51, 0.0  ;;  %v747_v54 = vadd.f32 %v729_v52, %v1188_v2 }
 0x326   : > { %754 = vst [vmem:[%s298_s20 + $0x8] sm:$0xff] %v750_v53  ;;  %v751_v55 = vmax.f32 %v747_v54, 0.0 }
 0x327   : > { %v742_v1 = vpop.f32.mrf.mxu1 }
 0x328   : > { %v743_v31 = vadd.f32 %v742_v1, %v700_v48  ;;  %755 = vst [vmem:[%s298_s20 + $0x10] sm:$0xff] %v751_v55 }
 0x32a   : > { %v748_v3 = vadd.f32 %v743_v31, %v1194_v5 }
 0x32c   : > { %v752_v32 = vmax.f32 %v748_v3, 0.0 }
 0x32e   : > { %756 = vst [vmem:[%s298_s20 + $0x18] sm:$0xff] %v752_v32 }
 0x32f   : > { %994 = shalt.err (!%p991_p4)
}
 0x330   : > { %s1048_s22 = smov 256   ;;  %s1049_s20 = smov 16  }
 0x331   : > { %875 = dma.vmem_to_hbm [thread:$0]  (%p1140_p11), %s771_s12, 512, %s773_s10, %s758_s28, %s1048_s22, %s1048_s22, %s1049_s20  }
 0x332 PF: > { %s787_s9 = sand.u32 1, %s1021_s24   ;;  %p1375_p7 = scmp.ge.s32.totalorder %s1033_s27, 2 }
 0x333   : > { %s788_s16 = scalar_lea.sflag [#allocation6], %s787_s9 }
 0x334   : > { %p882_p5 = pnand %p1375_p7, %p1144_p12 }
 0x336   : > { %p883_p8 = pneg %p882_p5 }
 0x338   : > { %1016 = dma.done.wait (%p883_p8), %s788_s16, 512  }
 0x339   : > { %1018 = vsyncadd (%p883_p8), %s788_s16, 4294966784  ;;  %s1376_s21 = sld [smem:[#allocation10_spill]]  ;;  %p20_p10 = scmp.ge.s32.totalorder %s1115_s30, 4  }
 0x33a   : > { %s1377_s24 = smov %s1025_s25  ;;  %s1378_s25 = smov %s1029_s26 }
 0x33b   : > { %s1380_s27 = smov %s1115_s30  ;;  %22 = sbr.rel (!%p20_p10) target bundleno = 5 (0x5), region = 103 }
 0x33f   : > { %s1379_s26 = smov %s1376_s21 }
 0x340   :  { %794 = vsyncpa [#allocation5], 1 }
 0x341   :  { %796 = vsyncpa [#allocation5 + $0x1], 1 }
 0x342   :  { %797 = vsyncpa [#allocation6], 1 }
 0x343   :  { %799 = vsyncpa [#allocation6 + $0x1], 1 }

</bundles_post_ra>
